<compile_context>
chip_gen: v7x
topology: tpu7x:2x2x1
jax: 0.10.0
libtpu: 0.0.40
codegen_flags: <defaults>
</compile_context>

<pallas_src>
import jax
import jax.numpy as jnp
from jax import lax
from jax.experimental import pallas as pl
from jax.experimental.pallas import tpu as pltpu


def _mlp_kernel(xT_ref, w1T_ref, b1_ref, w2_ref, b2_ref, outT_ref):
    # Layer 1: h_T = relu(W1^T @ x_T + b1)   -- (H, F) @ (F, TB) -> (H, TB)
    h = jnp.dot(w1T_ref[...], xT_ref[...], preferred_element_type=jnp.float32)
    h = jnp.maximum(h + b1_ref[...], 0.0)          # (H, TB) + (H, 1) broadcast

    O = w2_ref.shape[1]
    if O == 1:
        # Layer 2 (O == 1): keep it OFF the MXU. VPU broadcast-multiply with the
        # (H, 1) weight column, then a sublane reduction (XLU) -> lane-dense (1, TB).
        o = jnp.sum(h * w2_ref[...], axis=0, keepdims=True)
    else:
        # General O > 1: contract the H axis of (H, O) against (H, TB) -> (O, TB).
        o = lax.dot_general(w2_ref[...], h, (((0,), (0,)), ((), ())),
                            preferred_element_type=jnp.float32)

    outT_ref[...] = (o + b2_ref[...]).astype(outT_ref.dtype)   # + (O, 1) bias


def _round_up(x, m):
    return ((x + m - 1) // m) * m


def net_forward(x, w1, b1, w2, b2, *, tb=256):
    """x: (B, F); w1: (F, H); b1: (H,); w2: (H, O); b2: (O,).  Returns (B, O)."""
    B, F = x.shape
    H = w1.shape[1]
    O = w2.shape[1]

    # Batch tile: lane axis, multiple of 128, no bigger than the (padded) batch.
    tb = max(128, _round_up(tb, 128))
    tb = min(tb, _round_up(B, 128))
    B_pad = _round_up(B, tb)
    n_tiles = B_pad // tb

    # Feature-major layouts for the kernel.
    xT = x.T                                            # (F, B)
    if B_pad != B:
        xT = jnp.pad(xT, ((0, 0), (0, B_pad - B)))      # (F, B_pad)
    w1T = w1.T                                          # (H, F)
    b1c = b1.reshape(H, 1)                              # (H, 1)
    b2c = b2.reshape(O, 1)                              # (O, 1)

    flops = 2 * B_pad * F * H + 2 * B_pad * H * O + B_pad * H
    bytes_accessed = 4 * (B_pad * F + F * H + H + H * O + O + B_pad * O)

    outT = pl.pallas_call(
        _mlp_kernel,
        out_shape=jax.ShapeDtypeStruct((O, B_pad), x.dtype),
        grid=(n_tiles,),
        in_specs=[
            pl.BlockSpec((F, tb), lambda i: (0, i)),    # streamed activations
            pl.BlockSpec((H, F), lambda i: (0, 0)),     # VMEM-resident weights
            pl.BlockSpec((H, 1), lambda i: (0, 0)),
            pl.BlockSpec((H, O), lambda i: (0, 0)),
            pl.BlockSpec((O, 1), lambda i: (0, 0)),
        ],
        out_specs=pl.BlockSpec((O, tb), lambda i: (0, i)),  # lane-dense output
        compiler_params=pltpu.CompilerParams(
            dimension_semantics=("parallel",),          # shard batch tiles on v7x
        ),
        cost_estimate=pl.CostEstimate(
            flops=flops, transcendentals=0, bytes_accessed=bytes_accessed),
    )(xT, w1T, b1c, w2, b2c)

    return outT[:, :B].T                                # (B, O)


def init_params(key, n_feature, n_hidden, n_output):
    """Deterministic init matching nn.Linear shapes (weights pre-transposed to (in, out))."""
    k1, k2, k3, k4 = jax.random.split(key, 4)
    bound1 = 1.0 / (n_feature ** 0.5)
    w1 = jax.random.uniform(k1, (n_feature, n_hidden), jnp.float32, -bound1, bound1)
    b1 = jax.random.uniform(k2, (n_hidden,), jnp.float32, -bound1, bound1)
    bound2 = 1.0 / (n_hidden ** 0.5)
    w2 = jax.random.uniform(k3, (n_hidden, n_output), jnp.float32, -bound2, bound2)
    b2 = jax.random.uniform(k4, (n_output,), jnp.float32, -bound2, bound2)
    return w1, b1, w2, b2


if __name__ == "__main__":
    # Shapes implied by the quadratic-regression example (x unsqueezed to feature
    # vectors; small hidden layer, scalar prediction). Batch chosen large enough
    # to exercise the batch-tiled grid (2 tiles of 256 rows).
    batch, n_feature, n_hidden, n_output = 512, 4, 32, 1

    key = jax.random.PRNGKey(0)
    kx, kp = jax.random.split(key)
    x = jax.random.normal(kx, (batch, n_feature), jnp.float32)
    w1, b1, w2, b2 = init_params(kp, n_feature, n_hidden, n_output)

    out = net_forward(x, w1, b1, w2, b2, tb=256)
    out = jax.block_until_ready(out)

    # Pure-JAX reference check of forward semantics.
    ref = jnp.maximum(x @ w1 + b1, 0.0) @ w2 + b2
    assert out.shape == (batch, n_output)
    assert jnp.allclose(out, ref, atol=1e-5, rtol=1e-5)

    print("KERNEL_OK")
</pallas_src>

<mosaic_0001>
module attributes {stable_mosaic.version = 11 : i64} {
  func.func @_mlp_kernel(%arg0: i32, %arg1: memref<4x256xf32, #tpu.memory_space<vmem>>, %arg2: memref<32x4xf32, #tpu.memory_space<vmem>>, %arg3: memref<32x1xf32, #tpu.memory_space<vmem>>, %arg4: memref<32x1xf32, #tpu.memory_space<vmem>>, %arg5: memref<1x1xf32, #tpu.memory_space<vmem>>, %arg6: memref<1x256xf32, #tpu.memory_space<vmem>>) attributes {dimension_semantics = [#tpu.dimension_semantics<parallel>], iteration_bounds = array<i64: 2>, scalar_prefetch = 0 : i64, scratch_operands = 0 : i64, tpu.core_type = #tpu.core_type<tc>, window_params = [{transform_indices = @transform_0, window_bounds = array<i64: 4, 256>}, {pipeline_mode = #tpu.pipeline_mode<synchronous>, transform_indices = @transform_1, window_bounds = array<i64: 32, 4>}, {pipeline_mode = #tpu.pipeline_mode<synchronous>, transform_indices = @transform_2, window_bounds = array<i64: 32, 1>}, {pipeline_mode = #tpu.pipeline_mode<synchronous>, transform_indices = @transform_3, window_bounds = array<i64: 32, 1>}, {pipeline_mode = #tpu.pipeline_mode<synchronous>, transform_indices = @transform_4, window_bounds = array<i64: 1, 1>}, {transform_indices = @transform_5, window_bounds = array<i64: 1, 256>}]} {
    %c0 = arith.constant 0 : index
    %c0_0 = arith.constant 0 : index
    %0 = vector.load %arg2[%c0, %c0_0] : memref<32x4xf32, #tpu.memory_space<vmem>>, vector<32x4xf32>
    %c0_1 = arith.constant 0 : index
    %c0_2 = arith.constant 0 : index
    %1 = vector.load %arg1[%c0_1, %c0_2] : memref<4x256xf32, #tpu.memory_space<vmem>>, vector<4x256xf32>
    %cst = arith.constant dense<0.000000e+00> : vector<32x256xf32>
    %2 = tpu.matmul %0, %1, %cst {dimension_numbers = #tpu.dot_dimension_numbers<[1], [0], [0], [1], [0, 0, 1, 1], [], []>} : vector<32x4xf32>, vector<4x256xf32>, vector<32x256xf32> -> vector<32x256xf32>
    %c0_3 = arith.constant 0 : index
    %c0_4 = arith.constant 0 : index
    %3 = vector.load %arg3[%c0_3, %c0_4] : memref<32x1xf32, #tpu.memory_space<vmem>>, vector<32x1xf32>
    %4 = vector.broadcast %3 : vector<32x1xf32> to vector<32x256xf32>
    %5 = arith.addf %2, %4 : vector<32x256xf32>
    %cst_5 = arith.constant 0.000000e+00 : f32
    %6 = vector.broadcast %cst_5 : f32 to vector<32x256xf32>
    %7 = arith.maximumf %5, %6 : vector<32x256xf32>
    %c0_6 = arith.constant 0 : index
    %c0_7 = arith.constant 0 : index
    %8 = vector.load %arg4[%c0_6, %c0_7] : memref<32x1xf32, #tpu.memory_space<vmem>>, vector<32x1xf32>
    %9 = vector.broadcast %8 : vector<32x1xf32> to vector<32x256xf32>
    %10 = arith.mulf %7, %9 : vector<32x256xf32>
    %cst_8 = arith.constant dense<0.000000e+00> : vector<256xf32>
    %11 = vector.multi_reduction <add>, %10, %cst_8 [0] : vector<32x256xf32> to vector<256xf32>
    %12 = vector.shape_cast %11 : vector<256xf32> to vector<1x256xf32>
    %c0_9 = arith.constant 0 : index
    %c0_10 = arith.constant 0 : index
    %13 = vector.load %arg5[%c0_9, %c0_10] : memref<1x1xf32, #tpu.memory_space<vmem>>, vector<1x1xf32>
    %14 = vector.broadcast %13 : vector<1x1xf32> to vector<1x256xf32>
    %15 = arith.addf %12, %14 : vector<1x256xf32>
    %c0_11 = arith.constant 0 : index
    %c0_12 = arith.constant 0 : index
    %16 = vector.load %arg6[%c0_11, %c0_12] : memref<1x256xf32, #tpu.memory_space<vmem>>, vector<1x256xf32>
    tpu.vector_store %arg6[%c0_11, %c0_12], %15 {strides = array<i32>} : memref<1x256xf32, #tpu.memory_space<vmem>>, vector<1x256xf32>,
    return
  }
  func.func @transform_0(%arg0: i32) -> (i32, i32) {
    %c0_i32 = arith.constant 0 : i32
    %c0_i32_0 = arith.constant 0 : i32
    return %c0_i32, %arg0 : i32, i32
  }
  func.func @transform_1(%arg0: i32) -> (i32, i32) {
    %c0_i32 = arith.constant 0 : i32
    %c0_i32_0 = arith.constant 0 : i32
    %c0_i32_1 = arith.constant 0 : i32
    return %c0_i32, %c0_i32_0 : i32, i32
  }
  func.func @transform_2(%arg0: i32) -> (i32, i32) {
    %c0_i32 = arith.constant 0 : i32
    %c0_i32_0 = arith.constant 0 : i32
    %c0_i32_1 = arith.constant 0 : i32
    return %c0_i32, %c0_i32_0 : i32, i32
  }
  func.func @transform_3(%arg0: i32) -> (i32, i32) {
    %c0_i32 = arith.constant 0 : i32
    %c0_i32_0 = arith.constant 0 : i32
    %c0_i32_1 = arith.constant 0 : i32
    return %c0_i32, %c0_i32_0 : i32, i32
  }
  func.func @transform_4(%arg0: i32) -> (i32, i32) {
    %c0_i32 = arith.constant 0 : i32
    %c0_i32_0 = arith.constant 0 : i32
    %c0_i32_1 = arith.constant 0 : i32
    return %c0_i32, %c0_i32_0 : i32, i32
  }
  func.func @transform_5(%arg0: i32) -> (i32, i32) {
    %c0_i32 = arith.constant 0 : i32
    %c0_i32_0 = arith.constant 0 : i32
    return %c0_i32, %arg0 : i32, i32
  }
}

</mosaic_0001>

<bundles_post_ra>
// kernel: tpu_custom_call.1
= control target key start
LH: loop header
LB: loop body
LE: loop exit
PB: predicated region body
PF: predicated region fallthrough
CT: control target
= control target key end

     0   :  { %s839_s0 = inlined_call_operand.vmem [shape: f32[4,512], index: 0, kind: input, shape index: {}]   ;;  %s840_s1 = inlined_call_operand.vmem [shape: f32[32,4], index: 1, kind: input, shape index: {}]   ;;  %s841_s2 = inlined_call_operand.vmem [shape: f32[32,1], index: 2, kind: input, shape index: {}]   ;;  %s842_s3 = inlined_call_operand.vmem [shape: f32[32,1], index: 3, kind: input, shape index: {}]   ;;  %s843_s4 = inlined_call_operand.<no memory space> [shape: f32[1,1], index: 4, kind: input, shape index: {}]   ;;  %s844_s5 = inlined_call_operand.hbm [shape: f32[1,512], index: 5, kind: output, shape index: {}]  }
   0x1   :  { %v10_v0 = vstv %s843_s4 }
   0x2   :  { %11 = vst [vmem:[#allocation2] sm:$0x1] %v10_v0 }
   0x3   :  { %12 = vsyncpa [#allocation4], 0 }
   0x4   :  { %14 = vsyncpa [#allocation4 + $0x1], 0  ;;  %s700_s20 = smov 0   ;;  %s702_s21 = smov 0  }
   0x5   :  { %s704_s22 = smov 0   ;;  %s706_s23 = smov 0  }
   0x6 LB: > { %s721_s4 = sadd.s32 4294967295, %s661_s23   ;;  %s533_s24 = sadd.s32 4294967294, %s661_s23   ;;  %s661_s23 = sphi %s706_s23, %s850_s23   ;;  %s657_s22 = sphi %s704_s22, %s849_s22   ;;  %s653_s21 = sphi %s702_s21, %s848_s21   ;;  %s649_s20 = sphi %s700_s20, %s847_s20  }
   0x7   : > { %s725_s25 = sadd.s32 1, %s661_s23   ;;  %s137_s26 = sadd.s32 1, %s657_s22 }
   0x8   : > { %s134_s27 = ssub.s32 %s661_s23, %s725_s25  ;;  %p147_p0 = scmp.ne.s32.totalorder %s657_s22, %s653_s21 }
   0x9   : > { %p135_p1 = scmp.eq.s32.totalorder %s134_s27, 0  ;;  %p148_p2 = scmp.eq.s32.totalorder %s721_s4, 1 }
   0xa   : > { %p153_p3 = scmp.ne.s32.totalorder %s653_s21, %s649_s20  ;;  %p154_p4 = scmp.eq.s32.totalorder %s533_s24, 1 }
   0xb   : > { %s736_s28 = scalar_select %p135_p1, %s657_s22, %s137_s26  }
   0xc   : > { %p738_p5 = por %p148_p2, %p147_p0  ;;  %p742_p6 = por %p154_p4, %p153_p3 }
   0xd   : > { %p536_p7 = scmp.ge.s32.totalorder %s661_s23, 1  ;;  %p193_p8 = scmp.lt.s32.totalorder %s661_s23, 3 }
   0xf   : > { %p194_p9 = pnand %p536_p7, %p193_p8 }
  0x10   : > { %s538_s6 = sshll.u32 (!%p194_p9), %s721_s4, 1  ;;  %v663_v1 = vmov (!%p194_p9), 0.0   ;;  %v233_v2 = vld [vmem:[%s841_s2] sm:$0xff] (!%p194_p9)  ;;  %v664_v3 = vmov (!%p194_p9), 0   ;;  %v235_v4 = vld [vmem:[%s841_s2 + $0x10] sm:$0xff] (!%p194_p9)  ;;  %v234_v5 = vld [vmem:[%s841_s2 + $0x8] sm:$0xff] (!%p194_p9)  ;;  %v430_v62 = vlaneseq (!%p194_p9) }
  0x11   : > { %197 = sbr.rel (%p194_p9) target bundleno = 295 (0x127), region = 40  ;;  %p222_p10 = scmp.lt.s32.totalorder (!%p194_p9), %s538_s6, 3  ;;  %341 = vmatprep.mubr.f32.mxu0 (!%p194_p9), %v663_v1  ;;  %353 = vmatprep.mubr.f32.mxu1 (!%p194_p9), %v663_v1  ;;  %v236_v6 = vld [vmem:[%s841_s2 + $0x18] sm:$0xff] (!%p194_p9)  ;;  %vm272_vm0 = vcmask (!%p194_p9), 1043456   ;;  %v228_v9 = vld [vmem:[%s840_s1] sm:$0xff] (!%p194_p9)  ;;  %vm259_vm1 = vcmask (!%p194_p9), 31744  }
  0x12   : > { %596 = vset.pattern.permute.xlu0 (!%p194_p9), %v664_v3  ;;  %597 = vset.pattern.permute.xlu1 (!%p194_p9), %v664_v3  ;;  %v230_v10 = vld [vmem:[%s840_s1 + $0x10] sm:$0xff] (!%p194_p9)  ;;  %v374_v11 = vld [vmem:[%s842_s3] sm:$0xff] (!%p194_p9)  ;;  %v375_v12 = vld [vmem:[%s842_s3 + $0x8] sm:$0xff] (!%p194_p9)  ;;  %v431_v3 = vshrl.u32 (!%p194_p9), %v430_v62, 7  ;;  %s551_s24 = sshll.u32 (!%p194_p9), %s721_s4, 5  ;;  %vm456_vm2 = vcmp.lt.s32.totalorder (!%p194_p9), %v430_v62, 256 }
  0x13   : > { %239 = vperm.xlu0 (!%p194_p9), %596, %v233_v2   ;;  %249 = vperm.xlu1 (!%p194_p9), %597, %v235_v4   ;;  %v229_v13 = vld [vmem:[%s840_s1 + $0x8] sm:$0xff] (!%p194_p9)  ;;  %v231_v14 = vld [vmem:[%s840_s1 + $0x18] sm:$0xff] (!%p194_p9)  ;;  %v376_v15 = vld [vmem:[%s842_s3 + $0x10] sm:$0xff] (!%p194_p9)  ;;  %s797_s8 = scalar_lea.hbm (!%p194_p9), %s844_s5, %s551_s24  ;;  %s666_s4 = smov (!%p194_p9), [#allocation3]  }
  0x14   : > { %v377_v16 = vld [vmem:[%s842_s3 + $0x18] sm:$0xff] (!%p194_p9)  ;;  %v424_v17 = vld [vmem:[#allocation2] sm:$0x1] (!%p194_p9)  ;;  %s603_s11 = sshll.u32 (!%p194_p9), %s666_s4, 4  ;;  %s604_s11 = int_to_ptr.vmem [resolvable:$false] %s603_s11 }
  0x15   : > { %s605_s12 = scalar_lea.vmem (!%p194_p9), %s604_s11, 64 }
  0x17   : > { %244 = vperm.xlu0 (!%p194_p9), %596, %v234_v5   ;;  %254 = vperm.xlu1 (!%p194_p9), %597, %v236_v6  }
  0x18   : > { %s852_s6 = smov (!%p222_p10, %s538_s6), 3 }
  0x19   : > { %s539_s15 = sshll.u32 %s852_s6, 2 }
  0x1a   : > { %s225_s18 = scalar_lea.vmem %s839_s0, %s539_s15 }
  0x1b   : > { %v232_v7 = vld [vmem:[%s225_s18] sm:$0xff]  ;;  %380 = vperm.xlu0 %596, %v374_v11   ;;  %385 = vperm.xlu1 %597, %v375_v12   ;;  %s218_s18 = sand.u32 1, %s653_s21  }
  0x1c   : > { %v258_v8 = vcombine.high %v232_v7, %v232_v7  ;;  %s537_s19 = sshll.u32 %s218_s18, 1  ;;  %s460_s9 = scalar_lea.sflag [#allocation4], %s218_s18 }
  0x1d   : > { %s220_s26 = scalar_lea.vmem [#allocation3], %s537_s19 }
  0x1e   : > { %540 = vmatprep.subr.msk.mxu0 %vm272_vm0, %v258_v8  ;;  %552 = vmatprep.subr.msk.mxu1 %vm272_vm0, %v258_v8  ;;  %s474_s27 = sshll.u32 %s220_s26, 4  ;;  %s799_s27 = int_to_ptr.vmem [resolvable:$true] %s474_s27 }
  0x1f   : > { %541 = vmatpush1.msk.msra.mxu0 %vm272_vm0, %v232_v7  ;;  %553 = vmatpush1.msk.msra.mxu1 %vm272_vm0, %v232_v7  ;;  %v665_v7 = vmov 1966171168   ;;  %s599_s10 = scalar_lea.vmem %s799_s27, 32  ;;  %p606_p0 = scmp.lt.s32.totalorder %s799_s27, %s604_s11 }
  0x20   : > { %542 = vmatmul.mubr.msk.f32.vlgmr.msra.gmra.mrb[0].mxu0 %vm259_vm1, %v228_v9  ;;  %544 = vmatmul.mubr.msk.f32.vlgmr.msra.gmra.mrb[0].mxu1 %vm259_vm1, %v230_v10  ;;  %v440_v8 = vunpack.c.l.s4 %v665_v7  ;;  %v432_v10 = vsub.s32 0, %v431_v3  ;;  %p600_p11 = scmp.ne.s32.totalorder %s799_s27, %s599_s10  ;;  %p607_p1 = scmp.lt.s32.totalorder %s605_s12, %s599_s10 }
  0x21   : > { %347 = vmatprep.mubr.f32.mxu0 %v663_v1  ;;  %359 = vmatprep.mubr.f32.mxu1 %v663_v1 }
  0x22   : > { %390 = vperm.xlu0 %596, %v376_v15   ;;  %395 = vperm.xlu1 %597, %v377_v16   ;;  %v441_v15 = vunpack.c.0.s8 %v440_v8  ;;  %p601_p12 = pnand %p600_p11, %p738_p5  ;;  %p608_p2 = por %p607_p1, %p606_p0 }
  0x24   : > { %543 = vmatmul.mubr.msk.f32.gmra.mrb[2].mxu0 %vm259_vm1, %v229_v13  ;;  %545 = vmatmul.mubr.msk.f32.gmra.mrb[2].mxu1 %vm259_vm1, %v231_v14  ;;  %p602_p13 = pneg %p601_p12 }
  0x26   : > { %427 = vperm.xlu0 %596, %v424_v17   ;;  %p609_p3 = pnand %p608_p2, %p602_p13 }
  0x92   : > { %v240_v18 = vpop.permute.xlu0 %239  ;;  %v250_v19 = vpop.permute.xlu1 %249 }
  0x96   : > { %v245_v20 = vpop.permute.xlu0 %244  ;;  %v255_v21 = vpop.permute.xlu1 %254 }
  0x9a   : > { %v381_v28 = vpop.permute.xlu0 %380  ;;  %v386_v38 = vpop.permute.xlu1 %385 }
  0xa1   : > { %v391_v49 = vpop.permute.xlu0 %390  ;;  %v396_v55 = vpop.permute.xlu1 %395 }
  0xa5   : > { %v428_v12 = vpop.permute.xlu0 %427 }
  0xa6   : > { %v433_v17 = vrot.slane %v428_v12, %v432_v10 }
  0xf3   : > { %v343_v22 = vpop.f32.mrb[0].mxu0  ;;  %v355_v23 = vpop.f32.mrb[0].mxu1 }
  0xf4   : > { %v344_v24 = vadd.f32 %v343_v22, %v240_v18  ;;  %v345_v25 = vpop.f32.mrb[1].mxu0  ;;  %v357_v26 = vpop.f32.mrb[1].mxu1  ;;  %v356_v29 = vadd.f32 %v355_v23, %v250_v19 }
  0xf5   : > { %v346_v27 = vadd.f32 %v345_v25, %v240_v18  ;;  %v358_v30 = vadd.f32 %v357_v26, %v250_v19 }
  0xf6   : > { %v366_v33 = vmax.f32 %v344_v24, 0.0  ;;  %v370_v42 = vmax.f32 %v356_v29, 0.0 }
  0xf7   : > { %v349_v31 = vpop.f32.mrb[2].mxu0  ;;  %v361_v32 = vpop.f32.mrb[2].mxu1  ;;  %v367_v39 = vmax.f32 %v346_v27, 0.0  ;;  %v371_v44 = vmax.f32 %v358_v30, 0.0 }
  0xf8   : > { %v350_v34 = vadd.f32 %v349_v31, %v245_v20  ;;  %v362_v35 = vadd.f32 %v361_v32, %v255_v21  ;;  %v351_v36 = vpop.f32.mrb[3].mxu0  ;;  %v363_v37 = vpop.f32.mrb[3].mxu1  ;;  %v398_v46 = vmul.f32 %v381_v28, %v366_v33  ;;  %v402_v53 = vmul.f32 %v391_v49, %v370_v42 }
  0xf9   : > { %v352_v40 = vadd.f32 %v351_v36, %v245_v20  ;;  %v364_v41 = vadd.f32 %v363_v37, %v255_v21  ;;  %v399_v50 = vmul.f32 %v381_v28, %v367_v39  ;;  %v403_v56 = vmul.f32 %v391_v49, %v371_v44 }
  0xfa   : > { %v368_v43 = vmax.f32 %v350_v34, 0.0  ;;  %v372_v48 = vmax.f32 %v362_v35, 0.0  ;;  %v444_v21 = vsub.s32 %v441_v15, %v431_v3 }
  0xfb   : > { %v369_v45 = vmax.f32 %v352_v40, 0.0  ;;  %v373_v52 = vmax.f32 %v364_v41, 0.0 }
  0xfc   : > { %v400_v47 = vmul.f32 %v386_v38, %v368_v43  ;;  %v404_v58 = vmul.f32 %v396_v55, %v372_v48 }
  0xfd   : > { %v401_v51 = vmul.f32 %v386_v38, %v369_v45  ;;  %v405_v60 = vmul.f32 %v396_v55, %v373_v52 }
  0xfe   : > { %v406_v54 = vadd.f32 %v400_v47, %v398_v46 }
  0xff   : > { %v415_v57 = vadd.f32 %v401_v51, %v399_v50 }
 0x100   : > { %v407_v59 = vadd.f32 %v406_v54, %v402_v53 }
 0x101   : > { %v416_v61 = vadd.f32 %v415_v57, %v403_v56 }
 0x102   : > { %v408_v63 = vadd.f32 %v407_v59, %v404_v58 }
 0x103   : > { %v417_v0 = vadd.f32 %v416_v61, %v405_v60 }
 0x104   : > { %v409_v1 = vrot.slane %v408_v63, 4 }
 0x105   : > { %v418_v2 = vrot.slane %v417_v0, 4 }
 0x106   : > { %v410_v4 = vadd.f32 %v409_v1, %v408_v63 }
 0x107   : > { %v419_v5 = vadd.f32 %v418_v2, %v417_v0 }
 0x108   : > { %v411_v6 = vrot.slane %v410_v4, 2 }
 0x109   : > { %v420_v9 = vrot.slane %v419_v5, 2 }
 0x10a   : > { %v412_v11 = vadd.f32 %v411_v6, %v410_v4 }
 0x10b   : > { %v421_v13 = vadd.f32 %v420_v9, %v419_v5 }
 0x10c   : > { %v413_v14 = vrot.slane %v412_v11, 1 }
 0x10d   : > { %v422_v16 = vrot.slane %v421_v13, 1 }
 0x10e   : > { %v414_v18 = vadd.f32 %v413_v14, %v412_v11 }
 0x10f   : > { %v423_v19 = vadd.f32 %v422_v16, %v421_v13 }
 0x110   : > { %v434_v20 = vadd.f32 %v433_v17, %v414_v18 }
 0x111   : > { %v435_v22 = vadd.f32 %v433_v17, %v423_v19 }
 0x113   : > { %v438_v23 = vcombine.low %v434_v20, %v435_v22 }
 0x115   : > { %v445_v24 = vrot.slane %v438_v23, %v444_v21 }
 0x117   : > { %v452_v25 = vrot.slane %v445_v24, %v444_v21 }
 0x119   : > { %458 = vst.msk [vmem:[%s220_s26] sm:$0x3] %vm456_vm2, %v452_v25 }
 0x11a   : > { %612 = shalt.err (!%p609_p3)
}
 0x11b   : > { %s613_s13 = scalar_lea.hbm %s797_s8, 32  ;;  %s617_s16 = scalar_lea.hbm %s844_s5, 64 }
 0x11c   : > { %p614_p4 = scmp.ne.s32.totalorder %s797_s8, %s613_s13  ;;  %p618_p9 = scmp.lt.u32.totalorder %s797_s8, %s844_s5 }
 0x11d   : > { %p619_p10 = scmp.lt.u32.totalorder %s617_s16, %s613_s13  ;;  %p621_p12 = scmp.lt.u32.totalorder %s613_s13, %s797_s8 }
 0x11e   : > { %p615_p7 = pnand %p614_p4, %p738_p5 }
 0x11f   : > { %p620_p11 = por %p619_p10, %p618_p9 }
 0x120   : > { %p616_p8 = pneg %p615_p7 }
 0x121   : > { %p622_p13 = por %p621_p12, %p620_p11 }
 0x123   : > { %p623_p0 = pnand %p622_p13, %p616_p8 }
 0x125   : > { %626 = shalt.err (!%p623_p0)
}
 0x126   : > { %554 = dma.vmem_to_hbm [thread:$0]  (%p738_p5), %s799_s27, 32, %s797_s8, %s460_s9  }
 0x127 PF: > { %p560_p1 = scmp.ge.s32.totalorder %s661_s23, 2  ;;  %s486_s19 = sand.u32 1, %s649_s20  }
 0x128   : > { %s487_s24 = scalar_lea.sflag [#allocation4], %s486_s19 }
 0x129   : > { %p557_p2 = pnand %p560_p1, %p742_p6 }
 0x12b   : > { %644 = dma.done.wait (!%p557_p2), %s487_s24, 32  }
 0x12c   : > { %646 = vsyncadd (!%p557_p2), %s487_s24, 4294967264  ;;  %p17_p3 = scmp.ge.s32.totalorder %s725_s25, 4   ;;  %s847_s20 = smov %s653_s21 }
 0x12d   : > { %s848_s21 = smov %s657_s22  ;;  %s849_s22 = smov %s736_s28 }
 0x12e   : > { %s850_s23 = smov %s725_s25  ;;  %19 = sbr.rel (!%p17_p3) target bundleno = 6 (0x6), region = 75 }
 0x135   :  { %492 = vsyncpa [#allocation4], 1 }
 0x136   :  { %494 = vsyncpa [#allocation4 + $0x1], 1 }

</bundles_post_ra>
